<compile_context>
chip_gen: v7x
topology: tpu7x:2x2x1
jax: 0.10.0
libtpu: 0.0.40
codegen_flags: <defaults>
</compile_context>

<pallas_src>
import functools

import jax
import jax.numpy as jnp
from jax.experimental import pallas as pl
from jax.experimental.pallas import tpu as pltpu

_LANES = 128


def _round_up(x, m):
    return -(-x // m) * m


def _vmem_capacity_bytes():
    """Generation-aware physical VMEM size (falls back to v7x's 64 MiB)."""
    try:
        cap = getattr(pltpu.get_tpu_info(), "vmem_capacity_bytes", None)
        if cap:
            return int(cap)
    except Exception:
        pass
    return 64 * 2 ** 20


# --------------------------- stage 1: conv1 (+ downsample) + BN partials ----
def _conv1_kernel(a_ref, w1_ref, *rest, has_down):
    if has_down:
        wd_ref, h1_ref, r_ref, su1_ref, sq1_ref, sud_ref, sqd_ref = rest
    else:
        h1_ref, su1_ref, sq1_ref = rest

    a = a_ref[...]                                                # (L1, KCp) bf16
    h1 = jnp.dot(a, w1_ref[...], preferred_element_type=jnp.float32)
    h1_ref[...] = h1.astype(h1_ref.dtype)                         # bf16 intermediate
    su1_ref[...] = jnp.sum(h1, axis=0, keepdims=True)             # f32 partial sums
    sq1_ref[...] = jnp.sum(h1 * h1, axis=0, keepdims=True)

    if has_down:
        # 1x1 stride-s downsample == conv1's centre tap: wd lives at the
        # centre-tap rows of the im2col weight -> one extra MXU dot, same input.
        r = jnp.dot(a, wd_ref[...], preferred_element_type=jnp.float32)
        r_ref[...] = r.astype(r_ref.dtype)
        sud_ref[...] = jnp.sum(r, axis=0, keepdims=True)
        sqd_ref[...] = jnp.sum(r * r, axis=0, keepdims=True)


# --------------------------- stage 2: BN1 + ReLU + conv2 + BN2 partials -----
def _conv2_kernel(h1_ref, s1_ref, t1_ref, w2_ref, h2_ref, su2_ref, sq2_ref,
                  hp_ref, *, K, L1, pad, padl, dilation):
    Cp = h1_ref.shape[-1]
    # BN1 scale/shift (f32) + ReLU on the bf16-stored conv1 output.
    a = jnp.maximum(h1_ref[...].astype(jnp.float32) * s1_ref[...] + t1_ref[...], 0.0)

    # bf16 padded-L scratch; the h1 block lands at a sublane-aligned offset
    # (padl is a multiple of 8) and only the pad slabs are zeroed.
    if padl > 0:
        hp_ref[0:padl, :] = jnp.zeros((padl, Cp), hp_ref.dtype)
        hp_ref[padl + L1:padl + L1 + padl, :] = jnp.zeros((padl, Cp), hp_ref.dtype)
    hp_ref[padl:padl + L1, :] = a.astype(hp_ref.dtype)

    # conv2 = K accumulating MXU dots on tap views (no lane-concat materialization).
    acc = jnp.zeros((L1, Cp), jnp.float32)
    for k in range(K):
        off = padl - pad + k * dilation
        acc = acc + jnp.dot(hp_ref[off:off + L1, :], w2_ref[k],
                            preferred_element_type=jnp.float32)

    h2_ref[...] = acc.astype(h2_ref.dtype)
    su2_ref[...] = jnp.sum(acc, axis=0, keepdims=True)
    sq2_ref[...] = jnp.sum(acc * acc, axis=0, keepdims=True)


# --------------------------- stage 3: BN2 + residual + ReLU -> NCL output ---
def _finalize_kernel(h2_ref, s2_ref, t2_ref, *rest, cout, has_down):
    if has_down:
        r_ref, sd_ref, td_ref, o_ref = rest
        res = r_ref[...].astype(jnp.float32) * sd_ref[...] + td_ref[...]
    else:
        xres_ref, o_ref = rest
        res = xres_ref[...]                                       # f32 identity skip

    h2 = h2_ref[...].astype(jnp.float32) * s2_ref[...] + t2_ref[...]
    out = jnp.maximum(h2 + res, 0.0)                              # (L1, Cp) f32
    # slice to the real channel count BEFORE the transpose (less XLU / vreg work).
    o_ref[...] = jnp.transpose(out[:, :cout], (1, 0)).astype(o_ref.dtype)


# ------------------------------------------------------------------ wrapper
@functools.partial(jax.jit, static_argnames=("kernel", "stride", "dilation", "eps"))
def res_layer_forward(x, params, *, kernel, stride, dilation, eps=1e-5):
    """Fused ResLayer forward. x: (N, C_in, L) NCL f32 -> (N, C_out, L_out) NCL f32."""
    w1, g1, be1 = params["w1"], params["g1"], params["be1"]
    w2, g2, be2 = params["w2"], params["g2"], params["be2"]

    N, Cin, L = x.shape
    Cout, _, K = w1.shape
    assert K % 2 == 1 and K == kernel, "kernel must be an odd number"
    s, d = stride, dilation
    pad = (K // 2) * d
    L1 = (L + 2 * pad - d * (K - 1) - 1) // s + 1
    has_down = (Cin != Cout) or (s > 1)
    R = N * L1

    CoutP = _round_up(Cout, _LANES)
    KCp = _round_up(K * Cin, _LANES)            # dense K*Cin lane packing
    PADL = 0 if pad == 0 else _round_up(pad, 8)  # sublane-aligned scratch offset

    f32, bf16 = jnp.float32, jnp.bfloat16

    # ---- host-side layout prep (bf16 FIRST: transposes/pads move half the bytes)
    xb = x.astype(bf16)
    xt = jnp.transpose(xb, (0, 2, 1))                              # (N, L, Cin)
    xtp = jnp.pad(xt, ((0, 0), (pad, pad), (0, 0)))                # (N, L+2p, Cin)
    taps = [xtp[:, k * d:k * d + (L1 - 1) * s + 1:s, :] for k in range(K)]
    a1 = jnp.concatenate(taps, axis=-1)                            # (N, L1, K*Cin)
    a1 = jnp.pad(a1, ((0, 0), (0, 0), (0, KCp - K * Cin)))         # (N, L1, KCp) bf16

    def pad_vec(v):
        return jnp.zeros((1, CoutP), f32).at[0, :Cout].set(v.astype(f32))

    # conv1 weight in im2col space (rows = tap-major, channel-minor).
    w1f = jnp.zeros((KCp, CoutP), f32)
    w1f = w1f.at[:K * Cin, :Cout].set(
        jnp.transpose(w1, (2, 1, 0)).reshape(K * Cin, Cout)).astype(bf16)
    # conv2 weight as K separate (CoutP, CoutP) slabs -> K accumulating dots.
    w2f = jnp.zeros((K, CoutP, CoutP), f32)
    w2f = w2f.at[:, :Cout, :Cout].set(jnp.transpose(w2, (2, 1, 0))).astype(bf16)
    # (conv biases b1/b2 cancel exactly under training-mode BatchNorm -> not shipped.)

    if has_down:
        wdf = jnp.zeros((KCp, CoutP), f32)
        wdf = wdf.at[(K // 2) * Cin:(K // 2) * Cin + Cin, :Cout].set(
            jnp.transpose(params["wd"][:, :, 0], (1, 0))).astype(bf16)
    else:
        # identity residual stays f32 (stride==1, Cin==Cout -> L1 == L).
        xres = jnp.zeros((N, L1, CoutP), f32).at[:, :, :Cout].set(
            jnp.transpose(x, (0, 2, 1)))

    # ---- generation-aware VMEM budget ------------------------------------
    cap = _vmem_capacity_bytes()
    blocks = (L1 * KCp * 2 + 3 * L1 * CoutP * 2 + L1 * CoutP * 4 + 8 * CoutP * 4)
    weights = 2 * KCp * CoutP * 2 + K * CoutP * CoutP * 2
    scratch = (2 * PADL + L1) * CoutP * 2
    live_f32 = 8 * L1 * CoutP * 4
    per_step = 2 * blocks + weights + scratch + live_f32          # x2: double buffers
    vmem_limit = int(min(3 * cap // 4, max(16 * 2 ** 20, 2 * per_step)))

    cparams = pltpu.CompilerParams(dimension_semantics=("parallel",),
                                   vmem_limit_bytes=vmem_limit)

    # ---- common BlockSpecs (grid over the batch dimension) ----------------
    def bs_row(lanes):
        return pl.BlockSpec((None, L1, lanes), lambda n: (n, 0, 0))

    bs_stat = pl.BlockSpec((None, 1, CoutP), lambda n: (n, 0, 0))
    bs_vec = pl.BlockSpec((1, CoutP), lambda n: (0, 0))
    bs_w1 = pl.BlockSpec((KCp, CoutP), lambda n: (0, 0))
    bs_w2 = pl.BlockSpec((K, CoutP, CoutP), lambda n: (0, 0, 0))

    def bn_scale_shift(ssum, ssq, g, be):
        mu = jnp.sum(ssum, axis=0) / R                            # (1, CoutP)
        var = jnp.maximum(jnp.sum(ssq, axis=0) / R - mu * mu, 0.0)
        scale = pad_vec(g) * jax.lax.rsqrt(var + eps)
        shift = pad_vec(be) - mu * scale
        return scale, shift

    # ---- stage 1: conv1 (+downsample) + BN partials ------------------------
    stat_shape = jax.ShapeDtypeStruct((N, 1, CoutP), f32)
    row_bf16 = jax.ShapeDtypeStruct((N, L1, CoutP), bf16)
    if has_down:
        out_shape1 = (row_bf16, row_bf16, stat_shape, stat_shape, stat_shape, stat_shape)
        out_specs1 = (bs_row(CoutP), bs_row(CoutP), bs_stat, bs_stat, bs_stat, bs_stat)
        in_specs1 = [bs_row(KCp), bs_w1, bs_w1]
        args1 = (a1, w1f, wdf)
    else:
        out_shape1 = (row_bf16, stat_shape, stat_shape)
        out_specs1 = (bs_row(CoutP), bs_stat, bs_stat)
        in_specs1 = [bs_row(KCp), bs_w1]
        args1 = (a1, w1f)

    cost1 = pl.CostEstimate(
        flops=2 * R * KCp * CoutP * (2 if has_down else 1),
        transcendentals=0,
        bytes_accessed=int(a1.size * 2 + weights
                           + R * CoutP * 2 * (2 if has_down else 1) + N * 4 * CoutP * 4))

    res1 = pl.pallas_call(
        functools.partial(_conv1_kernel, has_down=has_down),
        grid=(N,), in_specs=in_specs1, out_specs=out_specs1, out_shape=out_shape1,
        compiler_params=cparams, cost_estimate=cost1,
    )(*args1)
    if has_down:
        h1_raw, r_raw, su1, sq1, sud, sqd = res1
    else:
        h1_raw, su1, sq1 = res1

    s1, t1 = bn_scale_shift(su1, sq1, g1, be1)

    # ---- stage 2: BN1 + ReLU + conv2 + BN2 partials ------------------------
    cost2 = pl.CostEstimate(
        flops=2 * R * K * CoutP * CoutP + 8 * R * CoutP,
        transcendentals=0,
        bytes_accessed=int(2 * R * CoutP * 2 + K * CoutP * CoutP * 2 + N * 2 * CoutP * 4))

    h2_raw, su2, sq2 = pl.pallas_call(
        functools.partial(_conv2_kernel, K=K, L1=L1, pad=pad, padl=PADL, dilation=d),
        grid=(N,),
        in_specs=[bs_row(CoutP), bs_vec, bs_vec, bs_w2],
        out_specs=(bs_row(CoutP), bs_stat, bs_stat),
        out_shape=(row_bf16, stat_shape, stat_shape),
        scratch_shapes=[pltpu.VMEM((2 * PADL + L1, CoutP), bf16)],
        compiler_params=cparams, cost_estimate=cost2,
    )(h1_raw, s1, t1, w2f)

    s2, t2 = bn_scale_shift(su2, sq2, g2, be2)

    # ---- stage 3: BN2 + residual + ReLU -> NCL output ----------------------
    if has_down:
        sd, td = bn_scale_shift(sud, sqd, params["gd"], params["bed"])
        in_specs3 = [bs_row(CoutP), bs_vec, bs_vec, bs_row(CoutP), bs_vec, bs_vec]
        args3 = (h2_raw, s2, t2, r_raw, sd, td)
    else:
        in_specs3 = [bs_row(CoutP), bs_vec, bs_vec, bs_row(CoutP)]
        args3 = (h2_raw, s2, t2, xres)

    cost3 = pl.CostEstimate(flops=6 * R * CoutP, transcendentals=0,
                            bytes_accessed=int(2 * R * CoutP * 4 + N * Cout * L1 * 4))

    return pl.pallas_call(
        functools.partial(_finalize_kernel, cout=Cout, has_down=has_down),
        grid=(N,),
        in_specs=in_specs3,
        out_specs=pl.BlockSpec((None, Cout, L1), lambda n: (n, 0, 0)),
        out_shape=jax.ShapeDtypeStruct((N, Cout, L1), f32),
        compiler_params=cparams, cost_estimate=cost3,
    )(*args3)


# ---------------- pure-JAX reference (independent check) ----------------
def ref_forward(x, params, *, kernel, stride, dilation, eps=1e-5):
    pad = kernel // 2 * dilation
    dn = ("NCH", "OIH", "NCH")

    def conv(h, w, b, s, p):
        y = jax.lax.conv_general_dilated(h, w, (s,), [(p, p)],
                                         rhs_dilation=(dilation,),
                                         dimension_numbers=dn)
        if b is not None:
            y = y + b[None, :, None]
        return y

    def bn(h, g, b):
        mu = jnp.mean(h, axis=(0, 2), keepdims=True)
        var = jnp.mean((h - mu) ** 2, axis=(0, 2), keepdims=True)
        return (h - mu) * jax.lax.rsqrt(var + eps) * g[None, :, None] + b[None, :, None]

    N, Cin, L = x.shape
    Cout = params["w1"].shape[0]
    has_down = (Cin != Cout) or (stride > 1)

    if has_down:
        r = jax.lax.conv_general_dilated(x, params["wd"], (stride,), [(0, 0)],
                                         dimension_numbers=dn)
        r = bn(r, params["gd"], params["bed"])
    else:
        r = x

    h = conv(x, params["w1"], params["b1"], stride, pad)
    h = jnp.maximum(bn(h, params["g1"], params["be1"]), 0.0)
    h = conv(h, params["w2"], params["b2"], 1, pad)
    h = bn(h, params["g2"], params["be2"])
    return jnp.maximum(h + r, 0.0)


if __name__ == "__main__":
    key = jax.random.PRNGKey(0)

    def make_params(k, cin, cout, ksz):
        ks = jax.random.split(k, 11)
        return dict(
            w1=0.3 * jax.random.normal(ks[0], (cout, cin, ksz), jnp.float32),
            b1=0.1 * jax.random.normal(ks[1], (cout,), jnp.float32),
            g1=1.0 + 0.1 * jax.random.normal(ks[2], (cout,), jnp.float32),
            be1=0.1 * jax.random.normal(ks[3], (cout,), jnp.float32),
            w2=0.3 * jax.random.normal(ks[4], (cout, cout, ksz), jnp.float32),
            b2=0.1 * jax.random.normal(ks[5], (cout,), jnp.float32),
            g2=1.0 + 0.1 * jax.random.normal(ks[6], (cout,), jnp.float32),
            be2=0.1 * jax.random.normal(ks[7], (cout,), jnp.float32),
            wd=0.3 * jax.random.normal(ks[8], (cout, cin, 1), jnp.float32),
            gd=1.0 + 0.1 * jax.random.normal(ks[9], (cout,), jnp.float32),
            bed=0.1 * jax.random.normal(ks[10], (cout,), jnp.float32),
        )

    cases = [
        # (N, Cin, Cout, L, kernel, stride, dilation)
        (2, 4, 8, 16, 3, 2, 1),   # downsample branch (stride 2, Cin != Cout)
        (2, 8, 8, 16, 3, 1, 1),   # identity-residual branch
        (2, 4, 8, 16, 3, 1, 2),   # dilation 2, 1x1 downsample
    ]
    for idx, (n, cin, cout, l, ksz, s, d) in enumerate(cases):
        kxi, kpi = jax.random.split(jax.random.fold_in(key, idx))
        x = jax.random.normal(kxi, (n, cin, l), jnp.float32)
        params = make_params(kpi, cin, cout, ksz)

        out = res_layer_forward(x, params, kernel=ksz, stride=s, dilation=d)
        out = jax.block_until_ready(out)

        ref = ref_forward(x, params, kernel=ksz, stride=s, dilation=d)
        assert out.shape == ref.shape, (out.shape, ref.shape)
        err = float(jnp.max(jnp.abs(out - ref)))
        # bf16 MXU operands + bf16 HBM intermediates vs. the f32 reference.
        assert err < 1e-1, f"case {idx}: max abs error {err}"

    print("KERNEL_OK")
</pallas_src>

<mosaic_0001>
module attributes {stable_mosaic.version = 11 : i64} {
  func.func @_conv1_kernel(%arg0: i32, %arg1: memref<1x8x128xbf16, #tpu.memory_space<vmem>>, %arg2: memref<128x128xbf16, #tpu.memory_space<vmem>>, %arg3: memref<128x128xbf16, #tpu.memory_space<vmem>>, %arg4: memref<1x8x128xbf16, #tpu.memory_space<vmem>>, %arg5: memref<1x8x128xbf16, #tpu.memory_space<vmem>>, %arg6: memref<1x1x128xf32, #tpu.memory_space<vmem>>, %arg7: memref<1x1x128xf32, #tpu.memory_space<vmem>>, %arg8: memref<1x1x128xf32, #tpu.memory_space<vmem>>, %arg9: memref<1x1x128xf32, #tpu.memory_space<vmem>>) attributes {dimension_semantics = [#tpu.dimension_semantics<parallel>], iteration_bounds = array<i64: 2>, scalar_prefetch = 0 : i64, scratch_operands = 0 : i64, tpu.core_type = #tpu.core_type<tc>, window_params = [{transform_indices = @transform_0, window_bounds = array<i64: 1, 8, 128>}, {pipeline_mode = #tpu.pipeline_mode<synchronous>, transform_indices = @transform_1, window_bounds = array<i64: 128, 128>}, {pipeline_mode = #tpu.pipeline_mode<synchronous>, transform_indices = @transform_2, window_bounds = array<i64: 128, 128>}, {transform_indices = @transform_3, window_bounds = array<i64: 1, 8, 128>}, {transform_indices = @transform_4, window_bounds = array<i64: 1, 8, 128>}, {transform_indices = @transform_5, window_bounds = array<i64: 1, 1, 128>}, {transform_indices = @transform_6, window_bounds = array<i64: 1, 1, 128>}, {transform_indices = @transform_7, window_bounds = array<i64: 1, 1, 128>}, {transform_indices = @transform_8, window_bounds = array<i64: 1, 1, 128>}]} {
    %c0 = arith.constant 0 : index
    %c0_0 = arith.constant 0 : index
    %c0_1 = arith.constant 0 : index
    %0 = vector.load %arg1[%c0, %c0_0, %c0_1] : memref<1x8x128xbf16, #tpu.memory_space<vmem>>, vector<1x8x128xbf16>
    %1 = vector.shape_cast %0 : vector<1x8x128xbf16> to vector<8x128xbf16>
    %c0_2 = arith.constant 0 : index
    %c0_3 = arith.constant 0 : index
    %2 = vector.load %arg2[%c0_2, %c0_3] : memref<128x128xbf16, #tpu.memory_space<vmem>>, vector<128x128xbf16>
    %cst = arith.constant dense<0.000000e+00> : vector<8x128xf32>
    %3 = tpu.matmul %1, %2, %cst {dimension_numbers = #tpu.dot_dimension_numbers<[1], [0], [0], [1], [0, 0, 1, 1], [], []>} : vector<8x128xbf16>, vector<128x128xbf16>, vector<8x128xf32> -> vector<8x128xf32>
    %4 = arith.truncf %3 : vector<8x128xf32> to vector<8x128xbf16>
    %c0_4 = arith.constant 0 : index
    %c0_5 = arith.constant 0 : index
    %c0_6 = arith.constant 0 : index
    %5 = vector.load %arg4[%c0_4, %c0_5, %c0_6] : memref<1x8x128xbf16, #tpu.memory_space<vmem>>, vector<1x8x128xbf16>
    %6 = vector.shape_cast %5 : vector<1x8x128xbf16> to vector<8x128xbf16>
    %7 = vector.shape_cast %4 : vector<8x128xbf16> to vector<1x8x128xbf16>
    tpu.vector_store %arg4[%c0_4, %c0_5, %c0_6], %7 {strides = array<i32>} : memref<1x8x128xbf16, #tpu.memory_space<vmem>>, vector<1x8x128xbf16>,
    %cst_7 = arith.constant dense<0.000000e+00> : vector<128xf32>
    %8 = vector.multi_reduction <add>, %3, %cst_7 [0] : vector<8x128xf32> to vector<128xf32>
    %9 = vector.shape_cast %8 : vector<128xf32> to vector<1x128xf32>
    %c0_8 = arith.constant 0 : index
    %c0_9 = arith.constant 0 : index
    %c0_10 = arith.constant 0 : index
    %10 = vector.load %arg6[%c0_8, %c0_9, %c0_10] : memref<1x1x128xf32, #tpu.memory_space<vmem>>, vector<1x1x128xf32>
    %11 = vector.shape_cast %10 : vector<1x1x128xf32> to vector<1x128xf32>
    %12 = vector.shape_cast %9 : vector<1x128xf32> to vector<1x1x128xf32>
    tpu.vector_store %arg6[%c0_8, %c0_9, %c0_10], %12 {strides = array<i32>} : memref<1x1x128xf32, #tpu.memory_space<vmem>>, vector<1x1x128xf32>,
    %13 = arith.mulf %3, %3 : vector<8x128xf32>
    %cst_11 = arith.constant dense<0.000000e+00> : vector<128xf32>
    %14 = vector.multi_reduction <add>, %13, %cst_11 [0] : vector<8x128xf32> to vector<128xf32>
    %15 = vector.shape_cast %14 : vector<128xf32> to vector<1x128xf32>
    %c0_12 = arith.constant 0 : index
    %c0_13 = arith.constant 0 : index
    %c0_14 = arith.constant 0 : index
    %16 = vector.load %arg7[%c0_12, %c0_13, %c0_14] : memref<1x1x128xf32, #tpu.memory_space<vmem>>, vector<1x1x128xf32>
    %17 = vector.shape_cast %16 : vector<1x1x128xf32> to vector<1x128xf32>
    %18 = vector.shape_cast %15 : vector<1x128xf32> to vector<1x1x128xf32>
    tpu.vector_store %arg7[%c0_12, %c0_13, %c0_14], %18 {strides = array<i32>} : memref<1x1x128xf32, #tpu.memory_space<vmem>>, vector<1x1x128xf32>,
    %c0_15 = arith.constant 0 : index
    %c0_16 = arith.constant 0 : index
    %19 = vector.load %arg3[%c0_15, %c0_16] : memref<128x128xbf16, #tpu.memory_space<vmem>>, vector<128x128xbf16>
    %cst_17 = arith.constant dense<0.000000e+00> : vector<8x128xf32>
    %20 = tpu.matmul %1, %19, %cst_17 {dimension_numbers = #tpu.dot_dimension_numbers<[1], [0], [0], [1], [0, 0, 1, 1], [], []>} : vector<8x128xbf16>, vector<128x128xbf16>, vector<8x128xf32> -> vector<8x128xf32>
    %21 = arith.truncf %20 : vector<8x128xf32> to vector<8x128xbf16>
    %c0_18 = arith.constant 0 : index
    %c0_19 = arith.constant 0 : index
    %c0_20 = arith.constant 0 : index
    %22 = vector.load %arg5[%c0_18, %c0_19, %c0_20] : memref<1x8x128xbf16, #tpu.memory_space<vmem>>, vector<1x8x128xbf16>
    %23 = vector.shape_cast %22 : vector<1x8x128xbf16> to vector<8x128xbf16>
    %24 = vector.shape_cast %21 : vector<8x128xbf16> to vector<1x8x128xbf16>
    tpu.vector_store %arg5[%c0_18, %c0_19, %c0_20], %24 {strides = array<i32>} : memref<1x8x128xbf16, #tpu.memory_space<vmem>>, vector<1x8x128xbf16>,
    %cst_21 = arith.constant dense<0.000000e+00> : vector<128xf32>
    %25 = vector.multi_reduction <add>, %20, %cst_21 [0] : vector<8x128xf32> to vector<128xf32>
    %26 = vector.shape_cast %25 : vector<128xf32> to vector<1x128xf32>
    %c0_22 = arith.constant 0 : index
    %c0_23 = arith.constant 0 : index
    %c0_24 = arith.constant 0 : index
    %27 = vector.load %arg8[%c0_22, %c0_23, %c0_24] : memref<1x1x128xf32, #tpu.memory_space<vmem>>, vector<1x1x128xf32>
    %28 = vector.shape_cast %27 : vector<1x1x128xf32> to vector<1x128xf32>
    %29 = vector.shape_cast %26 : vector<1x128xf32> to vector<1x1x128xf32>
    tpu.vector_store %arg8[%c0_22, %c0_23, %c0_24], %29 {strides = array<i32>} : memref<1x1x128xf32, #tpu.memory_space<vmem>>, vector<1x1x128xf32>,
    %30 = arith.mulf %20, %20 : vector<8x128xf32>
    %cst_25 = arith.constant dense<0.000000e+00> : vector<128xf32>
    %31 = vector.multi_reduction <add>, %30, %cst_25 [0] : vector<8x128xf32> to vector<128xf32>
    %32 = vector.shape_cast %31 : vector<128xf32> to vector<1x128xf32>
    %c0_26 = arith.constant 0 : index
    %c0_27 = arith.constant 0 : index
    %c0_28 = arith.constant 0 : index
    %33 = vector.load %arg9[%c0_26, %c0_27, %c0_28] : memref<1x1x128xf32, #tpu.memory_space<vmem>>, vector<1x1x128xf32>
    %34 = vector.shape_cast %33 : vector<1x1x128xf32> to vector<1x128xf32>
    %35 = vector.shape_cast %32 : vector<1x128xf32> to vector<1x1x128xf32>
    tpu.vector_store %arg9[%c0_26, %c0_27, %c0_28], %35 {strides = array<i32>} : memref<1x1x128xf32, #tpu.memory_space<vmem>>, vector<1x1x128xf32>,
    return
  }
  func.func @transform_0(%arg0: i32) -> (i32, i32, i32) {
    %c0_i32 = arith.constant 0 : i32
    %c0_i32_0 = arith.constant 0 : i32
    %c0_i32_1 = arith.constant 0 : i32
    return %arg0, %c0_i32, %c0_i32_0 : i32, i32, i32
  }
  func.func @transform_1(%arg0: i32) -> (i32, i32) {
    %c0_i32 = arith.constant 0 : i32
    %c0_i32_0 = arith.constant 0 : i32
    %c0_i32_1 = arith.constant 0 : i32
    return %c0_i32, %c0_i32_0 : i32, i32
  }
  func.func @transform_2(%arg0: i32) -> (i32, i32) {
    %c0_i32 = arith.constant 0 : i32
    %c0_i32_0 = arith.constant 0 : i32
    %c0_i32_1 = arith.constant 0 : i32
    return %c0_i32, %c0_i32_0 : i32, i32
  }
  func.func @transform_3(%arg0: i32) -> (i32, i32, i32) {
    %c0_i32 = arith.constant 0 : i32
    %c0_i32_0 = arith.constant 0 : i32
    %c0_i32_1 = arith.constant 0 : i32
    return %arg0, %c0_i32, %c0_i32_0 : i32, i32, i32
  }
  func.func @transform_4(%arg0: i32) -> (i32, i32, i32) {
    %c0_i32 = arith.constant 0 : i32
    %c0_i32_0 = arith.constant 0 : i32
    %c0_i32_1 = arith.constant 0 : i32
    return %arg0, %c0_i32, %c0_i32_0 : i32, i32, i32
  }
  func.func @transform_5(%arg0: i32) -> (i32, i32, i32) {
    %c0_i32 = arith.constant 0 : i32
    %c0_i32_0 = arith.constant 0 : i32
    %c0_i32_1 = arith.constant 0 : i32
    return %arg0, %c0_i32, %c0_i32_0 : i32, i32, i32
  }
  func.func @transform_6(%arg0: i32) -> (i32, i32, i32) {
    %c0_i32 = arith.constant 0 : i32
    %c0_i32_0 = arith.constant 0 : i32
    %c0_i32_1 = arith.constant 0 : i32
    return %arg0, %c0_i32, %c0_i32_0 : i32, i32, i32
  }
  func.func @transform_7(%arg0: i32) -> (i32, i32, i32) {
    %c0_i32 = arith.constant 0 : i32
    %c0_i32_0 = arith.constant 0 : i32
    %c0_i32_1 = arith.constant 0 : i32
    return %arg0, %c0_i32, %c0_i32_0 : i32, i32, i32
  }
  func.func @transform_8(%arg0: i32) -> (i32, i32, i32) {
    %c0_i32 = arith.constant 0 : i32
    %c0_i32_0 = arith.constant 0 : i32
    %c0_i32_1 = arith.constant 0 : i32
    return %arg0, %c0_i32, %c0_i32_0 : i32, i32, i32
  }
}

module attributes {stable_mosaic.version = 11 : i64} {
  func.func @_finalize_kernel(%arg0: i32, %arg1: memref<1x8x128xbf16, #tpu.memory_space<vmem>>, %arg2: memref<1x128xf32, #tpu.memory_space<vmem>>, %arg3: memref<1x128xf32, #tpu.memory_space<vmem>>, %arg4: memref<1x8x128xbf16, #tpu.memory_space<vmem>>, %arg5: memref<1x128xf32, #tpu.memory_space<vmem>>, %arg6: memref<1x128xf32, #tpu.memory_space<vmem>>, %arg7: memref<1x8x8xf32, #tpu.memory_space<vmem>>) attributes {dimension_semantics = [#tpu.dimension_semantics<parallel>], iteration_bounds = array<i64: 2>, scalar_prefetch = 0 : i64, scratch_operands = 0 : i64, tpu.core_type = #tpu.core_type<tc>, window_params = [{transform_indices = @transform_0, window_bounds = array<i64: 1, 8, 128>}, {pipeline_mode = #tpu.pipeline_mode<synchronous>, transform_indices = @transform_1, window_bounds = array<i64: 1, 128>}, {pipeline_mode = #tpu.pipeline_mode<synchronous>, transform_indices = @transform_2, window_bounds = array<i64: 1, 128>}, {transform_indices = @transform_3, window_bounds = array<i64: 1, 8, 128>}, {pipeline_mode = #tpu.pipeline_mode<synchronous>, transform_indices = @transform_4, window_bounds = array<i64: 1, 128>}, {pipeline_mode = #tpu.pipeline_mode<synchronous>, transform_indices = @transform_5, window_bounds = array<i64: 1, 128>}, {transform_indices = @transform_6, window_bounds = array<i64: 1, 8, 8>}]} {
    %c0 = arith.constant 0 : index
    %c0_0 = arith.constant 0 : index
    %c0_1 = arith.constant 0 : index
    %0 = vector.load %arg4[%c0, %c0_0, %c0_1] : memref<1x8x128xbf16, #tpu.memory_space<vmem>>, vector<1x8x128xbf16>
    %1 = vector.shape_cast %0 : vector<1x8x128xbf16> to vector<8x128xbf16>
    %2 = arith.extf %1 : vector<8x128xbf16> to vector<8x128xf32>
    %c0_2 = arith.constant 0 : index
    %c0_3 = arith.constant 0 : index
    %3 = vector.load %arg5[%c0_2, %c0_3] : memref<1x128xf32, #tpu.memory_space<vmem>>, vector<1x128xf32>
    %4 = vector.broadcast %3 : vector<1x128xf32> to vector<8x128xf32>
    %5 = arith.mulf %2, %4 : vector<8x128xf32>
    %c0_4 = arith.constant 0 : index
    %c0_5 = arith.constant 0 : index
    %6 = vector.load %arg6[%c0_4, %c0_5] : memref<1x128xf32, #tpu.memory_space<vmem>>, vector<1x128xf32>
    %7 = vector.broadcast %6 : vector<1x128xf32> to vector<8x128xf32>
    %8 = arith.addf %5, %7 : vector<8x128xf32>
    %c0_6 = arith.constant 0 : index
    %c0_7 = arith.constant 0 : index
    %c0_8 = arith.constant 0 : index
    %9 = vector.load %arg1[%c0_6, %c0_7, %c0_8] : memref<1x8x128xbf16, #tpu.memory_space<vmem>>, vector<1x8x128xbf16>
    %10 = vector.shape_cast %9 : vector<1x8x128xbf16> to vector<8x128xbf16>
    %11 = arith.extf %10 : vector<8x128xbf16> to vector<8x128xf32>
    %c0_9 = arith.constant 0 : index
    %c0_10 = arith.constant 0 : index
    %12 = vector.load %arg2[%c0_9, %c0_10] : memref<1x128xf32, #tpu.memory_space<vmem>>, vector<1x128xf32>
    %13 = vector.broadcast %12 : vector<1x128xf32> to vector<8x128xf32>
    %14 = arith.mulf %11, %13 : vector<8x128xf32>
    %c0_11 = arith.constant 0 : index
    %c0_12 = arith.constant 0 : index
    %15 = vector.load %arg3[%c0_11, %c0_12] : memref<1x128xf32, #tpu.memory_space<vmem>>, vector<1x128xf32>
    %16 = vector.broadcast %15 : vector<1x128xf32> to vector<8x128xf32>
    %17 = arith.addf %14, %16 : vector<8x128xf32>
    %18 = arith.addf %17, %8 : vector<8x128xf32>
    %cst = arith.constant 0.000000e+00 : f32
    %19 = vector.broadcast %cst : f32 to vector<8x128xf32>
    %20 = arith.maximumf %18, %19 : vector<8x128xf32>
    %21 = vector.extract_strided_slice %20 {offsets = [0, 0], sizes = [8, 8], strides = [1, 1]} : vector<8x128xf32> to vector<8x8xf32>
    %22 = tpu.transpose %21, [1, 0] : vector<8x8xf32> -> vector<8x8xf32>
    %c0_13 = arith.constant 0 : index
    %c0_14 = arith.constant 0 : index
    %c0_15 = arith.constant 0 : index
    %23 = vector.load %arg7[%c0_13, %c0_14, %c0_15] : memref<1x8x8xf32, #tpu.memory_space<vmem>>, vector<1x8x8xf32>
    %24 = vector.shape_cast %23 : vector<1x8x8xf32> to vector<8x8xf32>
    %25 = vector.shape_cast %22 : vector<8x8xf32> to vector<1x8x8xf32>
    tpu.vector_store %arg7[%c0_13, %c0_14, %c0_15], %25 {strides = array<i32>} : memref<1x8x8xf32, #tpu.memory_space<vmem>>, vector<1x8x8xf32>,
    return
  }
  func.func @transform_0(%arg0: i32) -> (i32, i32, i32) {
    %c0_i32 = arith.constant 0 : i32
    %c0_i32_0 = arith.constant 0 : i32
    %c0_i32_1 = arith.constant 0 : i32
    return %arg0, %c0_i32, %c0_i32_0 : i32, i32, i32
  }
  func.func @transform_1(%arg0: i32) -> (i32, i32) {
    %c0_i32 = arith.constant 0 : i32
    %c0_i32_0 = arith.constant 0 : i32
    %c0_i32_1 = arith.constant 0 : i32
    return %c0_i32, %c0_i32_0 : i32, i32
  }
  func.func @transform_2(%arg0: i32) -> (i32, i32) {
    %c0_i32 = arith.constant 0 : i32
    %c0_i32_0 = arith.constant 0 : i32
    %c0_i32_1 = arith.constant 0 : i32
    return %c0_i32, %c0_i32_0 : i32, i32
  }
  func.func @transform_3(%arg0: i32) -> (i32, i32, i32) {
    %c0_i32 = arith.constant 0 : i32
    %c0_i32_0 = arith.constant 0 : i32
    %c0_i32_1 = arith.constant 0 : i32
    return %arg0, %c0_i32, %c0_i32_0 : i32, i32, i32
  }
  func.func @transform_4(%arg0: i32) -> (i32, i32) {
    %c0_i32 = arith.constant 0 : i32
    %c0_i32_0 = arith.constant 0 : i32
    %c0_i32_1 = arith.constant 0 : i32
    return %c0_i32, %c0_i32_0 : i32, i32
  }
  func.func @transform_5(%arg0: i32) -> (i32, i32) {
    %c0_i32 = arith.constant 0 : i32
    %c0_i32_0 = arith.constant 0 : i32
    %c0_i32_1 = arith.constant 0 : i32
    return %c0_i32, %c0_i32_0 : i32, i32
  }
  func.func @transform_6(%arg0: i32) -> (i32, i32, i32) {
    %c0_i32 = arith.constant 0 : i32
    %c0_i32_0 = arith.constant 0 : i32
    %c0_i32_1 = arith.constant 0 : i32
    return %arg0, %c0_i32, %c0_i32_0 : i32, i32, i32
  }
}

module attributes {stable_mosaic.version = 11 : i64} {
  func.func @_conv2_kernel(%arg0: i32, %arg1: memref<1x8x128xbf16, #tpu.memory_space<vmem>>, %arg2: memref<1x128xf32, #tpu.memory_space<vmem>>, %arg3: memref<1x128xf32, #tpu.memory_space<vmem>>, %arg4: memref<3x128x128xbf16, #tpu.memory_space<vmem>>, %arg5: memref<1x8x128xbf16, #tpu.memory_space<vmem>>, %arg6: memref<1x1x128xf32, #tpu.memory_space<vmem>>, %arg7: memref<1x1x128xf32, #tpu.memory_space<vmem>>, %arg8: memref<24x128xbf16, #tpu.memory_space<vmem>>) attributes {dimension_semantics = [#tpu.dimension_semantics<parallel>], iteration_bounds = array<i64: 2>, scalar_prefetch = 0 : i64, scratch_operands = 1 : i64, tpu.core_type = #tpu.core_type<tc>, window_params = [{transform_indices = @transform_0, window_bounds = array<i64: 1, 8, 128>}, {pipeline_mode = #tpu.pipeline_mode<synchronous>, transform_indices = @transform_1, window_bounds = array<i64: 1, 128>}, {pipeline_mode = #tpu.pipeline_mode<synchronous>, transform_indices = @transform_2, window_bounds = array<i64: 1, 128>}, {pipeline_mode = #tpu.pipeline_mode<synchronous>, transform_indices = @transform_3, window_bounds = array<i64: 3, 128, 128>}, {transform_indices = @transform_4, window_bounds = array<i64: 1, 8, 128>}, {transform_indices = @transform_5, window_bounds = array<i64: 1, 1, 128>}, {transform_indices = @transform_6, window_bounds = array<i64: 1, 1, 128>}]} {
    %c0 = arith.constant 0 : index
    %c0_0 = arith.constant 0 : index
    %c0_1 = arith.constant 0 : index
    %0 = vector.load %arg1[%c0, %c0_0, %c0_1] : memref<1x8x128xbf16, #tpu.memory_space<vmem>>, vector<1x8x128xbf16>
    %1 = vector.shape_cast %0 : vector<1x8x128xbf16> to vector<8x128xbf16>
    %2 = arith.extf %1 : vector<8x128xbf16> to vector<8x128xf32>
    %c0_2 = arith.constant 0 : index
    %c0_3 = arith.constant 0 : index
    %3 = vector.load %arg2[%c0_2, %c0_3] : memref<1x128xf32, #tpu.memory_space<vmem>>, vector<1x128xf32>
    %4 = vector.broadcast %3 : vector<1x128xf32> to vector<8x128xf32>
    %5 = arith.mulf %2, %4 : vector<8x128xf32>
    %c0_4 = arith.constant 0 : index
    %c0_5 = arith.constant 0 : index
    %6 = vector.load %arg3[%c0_4, %c0_5] : memref<1x128xf32, #tpu.memory_space<vmem>>, vector<1x128xf32>
    %7 = vector.broadcast %6 : vector<1x128xf32> to vector<8x128xf32>
    %8 = arith.addf %5, %7 : vector<8x128xf32>
    %cst = arith.constant 0.000000e+00 : f32
    %9 = vector.broadcast %cst : f32 to vector<8x128xf32>
    %10 = arith.maximumf %8, %9 : vector<8x128xf32>
    %cst_6 = arith.constant 0.000000e+00 : bf16
    %11 = vector.broadcast %cst_6 : bf16 to vector<8x128xbf16>
    %c0_7 = arith.constant 0 : index
    %c0_8 = arith.constant 0 : index
    %12 = vector.load %arg8[%c0_7, %c0_8] : memref<24x128xbf16, #tpu.memory_space<vmem>>, vector<8x128xbf16>
    tpu.vector_store %arg8[%c0_7, %c0_8], %11 {strides = array<i32>} : memref<24x128xbf16, #tpu.memory_space<vmem>>, vector<8x128xbf16>,
    %cst_9 = arith.constant 0.000000e+00 : bf16
    %13 = vector.broadcast %cst_9 : bf16 to vector<8x128xbf16>
    %c16 = arith.constant 16 : index
    %c0_10 = arith.constant 0 : index
    %14 = vector.load %arg8[%c16, %c0_10] : memref<24x128xbf16, #tpu.memory_space<vmem>>, vector<8x128xbf16>
    tpu.vector_store %arg8[%c16, %c0_10], %13 {strides = array<i32>} : memref<24x128xbf16, #tpu.memory_space<vmem>>, vector<8x128xbf16>,
    %15 = arith.truncf %10 : vector<8x128xf32> to vector<8x128xbf16>
    %c8 = arith.constant 8 : index
    %c0_11 = arith.constant 0 : index
    %16 = vector.load %arg8[%c8, %c0_11] : memref<24x128xbf16, #tpu.memory_space<vmem>>, vector<8x128xbf16>
    tpu.vector_store %arg8[%c8, %c0_11], %15 {strides = array<i32>} : memref<24x128xbf16, #tpu.memory_space<vmem>>, vector<8x128xbf16>,
    %cst_12 = arith.constant 0.000000e+00 : f32
    %17 = vector.broadcast %cst_12 : f32 to vector<8x128xf32>
    %c7 = arith.constant 7 : index
    %c0_13 = arith.constant 0 : index
    %18 = vector.load %arg8[%c7, %c0_13] : memref<24x128xbf16, #tpu.memory_space<vmem>>, vector<8x128xbf16>
    %c0_14 = arith.constant 0 : index
    %c0_15 = arith.constant 0 : index
    %c0_16 = arith.constant 0 : index
    %19 = vector.load %arg4[%c0_14, %c0_15, %c0_16] : memref<3x128x128xbf16, #tpu.memory_space<vmem>>, vector<1x128x128xbf16>
    %20 = vector.shape_cast %19 : vector<1x128x128xbf16> to vector<128x128xbf16>
    %cst_17 = arith.constant dense<0.000000e+00> : vector<8x128xf32>
    %21 = tpu.matmul %18, %20, %cst_17 {dimension_numbers = #tpu.dot_dimension_numbers<[1], [0], [0], [1], [0, 0, 1, 1], [], []>} : vector<8x128xbf16>, vector<128x128xbf16>, vector<8x128xf32> -> vector<8x128xf32>
    %22 = arith.addf %17, %21 : vector<8x128xf32>
    %c8_18 = arith.constant 8 : index
    %c0_19 = arith.constant 0 : index
    %23 = vector.load %arg8[%c8_18, %c0_19] : memref<24x128xbf16, #tpu.memory_space<vmem>>, vector<8x128xbf16>
    %c1 = arith.constant 1 : index
    %c0_20 = arith.constant 0 : index
    %c0_21 = arith.constant 0 : index
    %24 = vector.load %arg4[%c1, %c0_20, %c0_21] : memref<3x128x128xbf16, #tpu.memory_space<vmem>>, vector<1x128x128xbf16>
    %25 = vector.shape_cast %24 : vector<1x128x128xbf16> to vector<128x128xbf16>
    %cst_22 = arith.constant dense<0.000000e+00> : vector<8x128xf32>
    %26 = tpu.matmul %23, %25, %cst_22 {dimension_numbers = #tpu.dot_dimension_numbers<[1], [0], [0], [1], [0, 0, 1, 1], [], []>} : vector<8x128xbf16>, vector<128x128xbf16>, vector<8x128xf32> -> vector<8x128xf32>
    %27 = arith.addf %22, %26 : vector<8x128xf32>
    %c9 = arith.constant 9 : index
    %c0_23 = arith.constant 0 : index
    %28 = vector.load %arg8[%c9, %c0_23] : memref<24x128xbf16, #tpu.memory_space<vmem>>, vector<8x128xbf16>
    %c2 = arith.constant 2 : index
    %c0_24 = arith.constant 0 : index
    %c0_25 = arith.constant 0 : index
    %29 = vector.load %arg4[%c2, %c0_24, %c0_25] : memref<3x128x128xbf16, #tpu.memory_space<vmem>>, vector<1x128x128xbf16>
    %30 = vector.shape_cast %29 : vector<1x128x128xbf16> to vector<128x128xbf16>
    %cst_26 = arith.constant dense<0.000000e+00> : vector<8x128xf32>
    %31 = tpu.matmul %28, %30, %cst_26 {dimension_numbers = #tpu.dot_dimension_numbers<[1], [0], [0], [1], [0, 0, 1, 1], [], []>} : vector<8x128xbf16>, vector<128x128xbf16>, vector<8x128xf32> -> vector<8x128xf32>
    %32 = arith.addf %27, %31 : vector<8x128xf32>
    %33 = arith.truncf %32 : vector<8x128xf32> to vector<8x128xbf16>
    %c0_27 = arith.constant 0 : index
    %c0_28 = arith.constant 0 : index
    %c0_29 = arith.constant 0 : index
    %34 = vector.load %arg5[%c0_27, %c0_28, %c0_29] : memref<1x8x128xbf16, #tpu.memory_space<vmem>>, vector<1x8x128xbf16>
    %35 = vector.shape_cast %34 : vector<1x8x128xbf16> to vector<8x128xbf16>
    %36 = vector.shape_cast %33 : vector<8x128xbf16> to vector<1x8x128xbf16>
    tpu.vector_store %arg5[%c0_27, %c0_28, %c0_29], %36 {strides = array<i32>} : memref<1x8x128xbf16, #tpu.memory_space<vmem>>, vector<1x8x128xbf16>,
    %cst_30 = arith.constant dense<0.000000e+00> : vector<128xf32>
    %37 = vector.multi_reduction <add>, %32, %cst_30 [0] : vector<8x128xf32> to vector<128xf32>
    %38 = vector.shape_cast %37 : vector<128xf32> to vector<1x128xf32>
    %c0_31 = arith.constant 0 : index
    %c0_32 = arith.constant 0 : index
    %c0_33 = arith.constant 0 : index
    %39 = vector.load %arg6[%c0_31, %c0_32, %c0_33] : memref<1x1x128xf32, #tpu.memory_space<vmem>>, vector<1x1x128xf32>
    %40 = vector.shape_cast %39 : vector<1x1x128xf32> to vector<1x128xf32>
    %41 = vector.shape_cast %38 : vector<1x128xf32> to vector<1x1x128xf32>
    tpu.vector_store %arg6[%c0_31, %c0_32, %c0_33], %41 {strides = array<i32>} : memref<1x1x128xf32, #tpu.memory_space<vmem>>, vector<1x1x128xf32>,
    %42 = arith.mulf %32, %32 : vector<8x128xf32>
    %cst_34 = arith.constant dense<0.000000e+00> : vector<128xf32>
    %43 = vector.multi_reduction <add>, %42, %cst_34 [0] : vector<8x128xf32> to vector<128xf32>
    %44 = vector.shape_cast %43 : vector<128xf32> to vector<1x128xf32>
    %c0_35 = arith.constant 0 : index
    %c0_36 = arith.constant 0 : index
    %c0_37 = arith.constant 0 : index
    %45 = vector.load %arg7[%c0_35, %c0_36, %c0_37] : memref<1x1x128xf32, #tpu.memory_space<vmem>>, vector<1x1x128xf32>
    %46 = vector.shape_cast %45 : vector<1x1x128xf32> to vector<1x128xf32>
    %47 = vector.shape_cast %44 : vector<1x128xf32> to vector<1x1x128xf32>
    tpu.vector_store %arg7[%c0_35, %c0_36, %c0_37], %47 {strides = array<i32>} : memref<1x1x128xf32, #tpu.memory_space<vmem>>, vector<1x1x128xf32>,
    return
  }
  func.func @transform_0(%arg0: i32) -> (i32, i32, i32) {
    %c0_i32 = arith.constant 0 : i32
    %c0_i32_0 = arith.constant 0 : i32
    %c0_i32_1 = arith.constant 0 : i32
    return %arg0, %c0_i32, %c0_i32_0 : i32, i32, i32
  }
  func.func @transform_1(%arg0: i32) -> (i32, i32) {
    %c0_i32 = arith.constant 0 : i32
    %c0_i32_0 = arith.constant 0 : i32
    %c0_i32_1 = arith.constant 0 : i32
    return %c0_i32, %c0_i32_0 : i32, i32
  }
  func.func @transform_2(%arg0: i32) -> (i32, i32) {
    %c0_i32 = arith.constant 0 : i32
    %c0_i32_0 = arith.constant 0 : i32
    %c0_i32_1 = arith.constant 0 : i32
    return %c0_i32, %c0_i32_0 : i32, i32
  }
  func.func @transform_3(%arg0: i32) -> (i32, i32, i32) {
    %c0_i32 = arith.constant 0 : i32
    %c0_i32_0 = arith.constant 0 : i32
    %c0_i32_1 = arith.constant 0 : i32
    %c0_i32_2 = arith.constant 0 : i32
    return %c0_i32, %c0_i32_0, %c0_i32_1 : i32, i32, i32
  }
  func.func @transform_4(%arg0: i32) -> (i32, i32, i32) {
    %c0_i32 = arith.constant 0 : i32
    %c0_i32_0 = arith.constant 0 : i32
    %c0_i32_1 = arith.constant 0 : i32
    return %arg0, %c0_i32, %c0_i32_0 : i32, i32, i32
  }
  func.func @transform_5(%arg0: i32) -> (i32, i32, i32) {
    %c0_i32 = arith.constant 0 : i32
    %c0_i32_0 = arith.constant 0 : i32
    %c0_i32_1 = arith.constant 0 : i32
    return %arg0, %c0_i32, %c0_i32_0 : i32, i32, i32
  }
  func.func @transform_6(%arg0: i32) -> (i32, i32, i32) {
    %c0_i32 = arith.constant 0 : i32
    %c0_i32_0 = arith.constant 0 : i32
    %c0_i32_1 = arith.constant 0 : i32
    return %arg0, %c0_i32, %c0_i32_0 : i32, i32, i32
  }
}

</mosaic_0001>

<bundles_post_ra>
// kernel: res_layer_forward.5
= control target key start
LH: loop header
LB: loop body
LE: loop exit
PB: predicated region body
PF: predicated region fallthrough
CT: control target
= control target key end

     0   :  { %11 = vsyncpa [#allocation3], 0  ;;  %s691_s0 = inlined_call_operand.vmem [shape: bf16[2,8,128], index: 0, kind: input, shape index: {}]   ;;  %s692_s1 = inlined_call_operand.vmem [shape: f32[1,128], index: 1, kind: input, shape index: {}]   ;;  %s693_s2 = inlined_call_operand.vmem [shape: f32[1,128], index: 2, kind: input, shape index: {}]   ;;  %s694_s3 = inlined_call_operand.vmem [shape: bf16[2,8,128], index: 3, kind: input, shape index: {}]   ;;  %s695_s4 = inlined_call_operand.vmem [shape: f32[1,128], index: 4, kind: input, shape index: {}]   ;;  %s696_s5 = inlined_call_operand.vmem [shape: f32[1,128], index: 5, kind: input, shape index: {}]   ;;  %s697_s6 = inlined_call_operand.hbm [shape: f32[2,8,8], index: 6, kind: output, shape index: {}]  }
   0x1   :  { %13 = vsyncpa [#allocation3 + $0x1], 0  ;;  %s576_s21 = smov 0   ;;  %s578_s22 = smov 0  }
   0x2   :  { %s580_s23 = smov 0   ;;  %s582_s24 = smov 0  }
   0x3 LB: > { %s597_s25 = sadd.s32 4294967295, %s538_s24   ;;  %s421_s26 = sadd.s32 4294967294, %s538_s24   ;;  %s538_s24 = sphi %s582_s24, %s703_s24   ;;  %s534_s23 = sphi %s580_s23, %s702_s23   ;;  %s530_s22 = sphi %s578_s22, %s701_s22   ;;  %s526_s21 = sphi %s576_s21, %s700_s21  }
   0x4   : > { %s601_s27 = sadd.s32 1, %s538_s24   ;;  %s162_s28 = sadd.s32 1, %s534_s23 }
   0x5   : > { %s159_s29 = ssub.s32 %s538_s24, %s601_s27  ;;  %p172_p0 = scmp.ne.s32.totalorder %s534_s23, %s530_s22 }
   0x6   : > { %p160_p1 = scmp.eq.s32.totalorder %s159_s29, 0  ;;  %p173_p2 = scmp.eq.s32.totalorder %s597_s25, 1 }
   0x7   : > { %p178_p3 = scmp.ne.s32.totalorder %s530_s22, %s526_s21  ;;  %p179_p4 = scmp.eq.s32.totalorder %s421_s26, 1 }
   0x8   : > { %s612_s30 = scalar_select %p160_p1, %s534_s23, %s162_s28  }
   0x9   : > { %p614_p5 = por %p173_p2, %p172_p0  ;;  %p618_p6 = por %p179_p4, %p178_p3 }
   0xa   : > { %p424_p7 = scmp.ge.s32.totalorder %s538_s24, 1  ;;  %p223_p8 = scmp.lt.s32.totalorder %s538_s24, 3 }
   0xc   : > { %p224_p9 = pnand %p424_p7, %p223_p8 }
   0xd   : > { %p256_p10 = scmp.lt.s32.totalorder (!%p224_p9), %s597_s25, 1  ;;  %v428_v0 = vld [vmem:[%s695_s4] ss:$0 sm:$0xff] (!%p224_p9)  ;;  %s433_s12 = sshll.u32 (!%p224_p9), %s597_s25, 7  ;;  %vm334_vm0 = vcmask (!%p224_p9), 64512  }
   0xe   : > { %227 = sbr.rel (%p224_p9) target bundleno = 180 (0xb4), region = 44  ;;  %v430_v3 = vld [vmem:[%s692_s1] ss:$0 sm:$0xff] (!%p224_p9)  ;;  %s649_s17 = scalar_lea.hbm (!%p224_p9), %s697_s6, %s433_s12 }
   0xf   : > { %v429_v6 = vld [vmem:[%s696_s5] ss:$0 sm:$0xff] (!%p224_p9) }
  0x10   : > { %v431_v7 = vld [vmem:[%s693_s2] ss:$0 sm:$0xff] (!%p224_p9) }
  0x15   : > { %s257_s9 = scalar_select %p256_p10, %s597_s25, 1 }
  0x16   : > { %s540_s25 = smov [#allocation2]  }
  0x17   : > { %s426_s10 = sshll.u32 %s257_s9, 2  ;;  %s480_s20 = sshll.u32 %s540_s25, 4  ;;  %s481_s20 = int_to_ptr.vmem [resolvable:$false] %s480_s20 }
  0x18   : > { %s259_s13 = scalar_lea.vmem %s691_s0, %s426_s10  ;;  %s263_s16 = scalar_lea.vmem %s694_s3, %s426_s10 }
  0x19   : > { %v264_v1 = vld [vmem:[%s263_s16] sm:$0xf]  ;;  %s253_s10 = sand.u32 1, %s530_s22   ;;  %s482_s26 = scalar_lea.vmem %s481_s20, 256 }
  0x1a   : > { %v282_v2 = vld [vmem:[%s259_s13] sm:$0xf]  ;;  %v265_v4 = vunpack.c.l.bf16 %v264_v1  ;;  %s425_s11 = sshll.u32 %s253_s10, 3  ;;  %s337_s18 = scalar_lea.sflag [#allocation3], %s253_s10 }
  0x1b   : > { %v283_v5 = vunpack.c.l.bf16 %v282_v2  ;;  %s255_s13 = scalar_lea.vmem [#allocation2], %s425_s11 }
  0x1c   : > { %v273_v8 = vmul.f32 %v428_v0, %v265_v4  ;;  %s350_s14 = sshll.u32 %s255_s13, 4  ;;  %s651_s14 = int_to_ptr.vmem [resolvable:$true] %s350_s14 }
  0x1d   : > { %v291_v9 = vmul.f32 %v430_v3, %v283_v5  ;;  %s476_s19 = scalar_lea.vmem %s651_s14, 128  ;;  %p483_p0 = scmp.lt.s32.totalorder %s651_s14, %s481_s20 }
  0x1e   : > { %v281_v10 = vadd.f32 %v429_v6, %v273_v8  ;;  %p477_p11 = scmp.ne.s32.totalorder %s651_s14, %s476_s19  ;;  %p484_p1 = scmp.lt.s32.totalorder %s482_s26, %s476_s19 }
  0x1f   : > { %v299_v11 = vadd.f32 %v431_v7, %v291_v9 }
  0x20   : > { %p478_p12 = pnand %p477_p11, %p614_p5  ;;  %p485_p2 = por %p484_p1, %p483_p0 }
  0x21   : > { %v300_v12 = vadd.f32 %v299_v11, %v281_v10 }
  0x22   : > { %p479_p13 = pneg %p478_p12 }
  0x23   : > { %v301_v13 = vmax.f32 %v300_v12, 0.0 }
  0x24   : > { %p486_p3 = pnand %p485_p2, %p479_p13 }
  0x25   : > { %302 = vxpose.xlu0.b32.start.end [1/1] (short) (narrow) %v301_v13, 8 }
  0xa5   : > { %v318_v14 = vpop.trf.xlu0 }
  0xa6   : > { %335 = vst.msk [vmem:[%s255_s13] sm:$0xff] %vm334_vm0, %v318_v14 }
  0xa7   : > { %489 = shalt.err (!%p486_p3)
}
  0xa8   : > { %s490_s28 = scalar_lea.hbm %s649_s17, 128  ;;  %s494_s10 = scalar_lea.hbm %s697_s6, 256 }
  0xa9   : > { %p491_p4 = scmp.ne.s32.totalorder %s649_s17, %s490_s28  ;;  %p495_p9 = scmp.lt.u32.totalorder %s649_s17, %s697_s6 }
  0xaa   : > { %p496_p10 = scmp.lt.u32.totalorder %s494_s10, %s490_s28  ;;  %p498_p12 = scmp.lt.u32.totalorder %s490_s28, %s649_s17 }
  0xab   : > { %p492_p7 = pnand %p491_p4, %p614_p5 }
  0xac   : > { %p497_p11 = por %p496_p10, %p495_p9 }
  0xad   : > { %p493_p8 = pneg %p492_p7 }
  0xae   : > { %p499_p13 = por %p498_p12, %p497_p11 }
  0xb0   : > { %p500_p0 = pnand %p499_p13, %p493_p8 }
  0xb2   : > { %503 = shalt.err (!%p500_p0)
}
  0xb3   : > { %436 = dma.vmem_to_hbm [thread:$0]  (%p614_p5), %s651_s14, 128, %s649_s17, %s337_s18  }
  0xb4 PF: > { %p442_p1 = scmp.ge.s32.totalorder %s538_s24, 2  ;;  %s362_s13 = sand.u32 1, %s526_s21  }
  0xb5   : > { %s363_s15 = scalar_lea.sflag [#allocation3], %s362_s13 }
  0xb6   : > { %p439_p2 = pnand %p442_p1, %p618_p6 }
  0xb8   : > { %521 = dma.done.wait (!%p439_p2), %s363_s15, 128  }
  0xb9   : > { %523 = vsyncadd (!%p439_p2), %s363_s15, 4294967168  ;;  %p16_p3 = scmp.ge.s32.totalorder %s601_s27, 4   ;;  %s700_s21 = smov %s530_s22 }
  0xba   : > { %s701_s22 = smov %s534_s23  ;;  %s702_s23 = smov %s612_s30 }
  0xbb   : > { %s703_s24 = smov %s601_s27  ;;  %18 = sbr.rel (!%p16_p3) target bundleno = 3 (0x3), region = 82 }
  0xc2   :  { %368 = vsyncpa [#allocation3], 1 }
  0xc3   :  { %370 = vsyncpa [#allocation3 + $0x1], 1 }

// kernel: res_layer_forward.3
= control target key start
LH: loop header
LB: loop body
LE: loop exit
PB: predicated region body
PF: predicated region fallthrough
CT: control target
= control target key end

     0   :  { %s937_s27 = smov 0   ;;  %s1033_s0 = inlined_call_operand.vmem [shape: bf16[2,8,128], index: 0, kind: input, shape index: {}]   ;;  %s1034_s1 = inlined_call_operand.vmem [shape: bf16[128,128], index: 1, kind: input, shape index: {}]   ;;  %s1035_s2 = inlined_call_operand.vmem [shape: bf16[128,128], index: 2, kind: input, shape index: {}]   ;;  %s1036_s3 = inlined_call_operand.vmem [shape: bf16[2,8,128], index: 3, kind: output, shape index: {0}]   ;;  %s1037_s4 = inlined_call_operand.vmem [shape: bf16[2,8,128], index: 4, kind: output, shape index: {1}]   ;;  %s1038_s5 = inlined_call_operand.vmem [shape: f32[2,1,128], index: 5, kind: output, shape index: {2}]   ;;  %s1039_s6 = inlined_call_operand.vmem [shape: f32[2,1,128], index: 6, kind: output, shape index: {3}]   ;;  %s1040_s7 = inlined_call_operand.vmem [shape: f32[2,1,128], index: 7, kind: output, shape index: {4}]   ;;  %s1041_s8 = inlined_call_operand.vmem [shape: f32[2,1,128], index: 8, kind: output, shape index: {5}]  }
   0x1 LB: > { %s772_s28 = sadd.s32 4294967295, %s888_s27   ;;  %p776_p0 = scmp.ge.s32.totalorder %s888_s27, 1  ;;  %s888_s27 = sphi %s937_s27, %s19_s27  }
   0x2   : > { %p272_p1 = scmp.lt.s32.totalorder %s888_s27, 3 }
   0x4   : > { %p273_p2 = pnand %p776_p0, %p272_p1 }
   0x5   : > { %v866_v0 = vld [vmem:[%s1034_s1] sm:$0xff] (!%p273_p2)   ;;  %v890_v1 = vmov (!%p273_p2), 0.0   ;;  %v868_v3 = vld [vmem:[%s1034_s1 + $0x8] sm:$0xff] (!%p273_p2)   ;;  %vm891_vm0 = vmmov (!%p273_p2), 0   ;;  %v870_v5 = vld [vmem:[%s1034_s1 + $0x10] sm:$0xff] (!%p273_p2)   ;;  %p320_p3 = scmp.lt.s32.totalorder (!%p273_p2), %s772_s28, 1 }
   0x6   : > { %276 = sbr.rel (%p273_p2) target bundleno = 266 (0x10a), region = 32  ;;  %816 = vmatprep.subr.bf16.mxu0 (!%p273_p2), %v890_v1  ;;  %836 = vmatprep.subr.bf16.mxu1 (!%p273_p2), %v890_v1  ;;  %v867_v2 = vld [vmem:[%s1035_s2] sm:$0xff] (!%p273_p2)   ;;  %v869_v4 = vld [vmem:[%s1035_s2 + $0x8] sm:$0xff] (!%p273_p2)   ;;  %v871_v6 = vld [vmem:[%s1035_s2 + $0x10] sm:$0xff] (!%p273_p2)  }
   0x7   : > { %817 = vmatpush3.bf16.msra.mxu0 (!%p273_p2), %v866_v0  ;;  %832 = vmatprep.mubr.msk.bf16.mxu0 (!%p273_p2), %vm891_vm0, %v890_v1  ;;  %v872_v7 = vld [vmem:[%s1034_s1 + $0x18] sm:$0xff] (!%p273_p2)   ;;  %v874_v9 = vld [vmem:[%s1034_s1 + $0x20] sm:$0xff] (!%p273_p2)   ;;  %v876_v11 = vld [vmem:[%s1034_s1 + $0x28] sm:$0xff] (!%p273_p2)  }
   0x8   : > { %837 = vmatpush3.bf16.msra.mxu1 (!%p273_p2), %v867_v2  ;;  %818 = vmatprep.subr.bf16.mxu0 (!%p273_p2), %v890_v1  ;;  %v873_v8 = vld [vmem:[%s1035_s2 + $0x18] sm:$0xff] (!%p273_p2)   ;;  %v875_v10 = vld [vmem:[%s1035_s2 + $0x20] sm:$0xff] (!%p273_p2)   ;;  %v877_v12 = vld [vmem:[%s1035_s2 + $0x28] sm:$0xff] (!%p273_p2)  }
   0x9   : > { %838 = vmatprep.subr.bf16.mxu1 (!%p273_p2), %v890_v1  ;;  %852 = vmatprep.mubr.msk.bf16.mxu1 (!%p273_p2), %vm891_vm0, %v890_v1  ;;  %v878_v13 = vld [vmem:[%s1034_s1 + $0x30] sm:$0xff] (!%p273_p2)   ;;  %v880_v15 = vld [vmem:[%s1034_s1 + $0x38] sm:$0xff] (!%p273_p2)  }
   0xa   : > { %v879_v14 = vld [vmem:[%s1035_s2 + $0x30] sm:$0xff] (!%p273_p2)   ;;  %v881_v16 = vld [vmem:[%s1035_s2 + $0x38] sm:$0xff] (!%p273_p2)  }
   0xb   : > { %819 = vmatpush3.bf16.msra.mxu0 (!%p273_p2), %v868_v3 }
   0xc   : > { %839 = vmatpush3.bf16.msra.mxu1 (!%p273_p2), %v869_v4  ;;  %820 = vmatprep.subr.bf16.mxu0 (!%p273_p2), %v890_v1 }
   0xd   : > { %840 = vmatprep.subr.bf16.mxu1 %v890_v1  ;;  %s1043_s28 = smov (!%p320_p3, %s772_s28), 1 }
   0xe   : > { %s994_s15 = sshll.u32 %s1043_s28, 2  ;;  %s334_s11 = scalar_lea.vmem %s1038_s5, %s1043_s28 }
   0xf   : > { %821 = vmatpush3.bf16.msra.mxu0 %v870_v5  ;;  %s323_s22 = scalar_lea.vmem %s1033_s0, %s994_s15  ;;  %s327_s25 = scalar_lea.vmem %s1036_s3, %s994_s15 }
  0x10   : > { %841 = vmatpush3.bf16.msra.mxu1 %v871_v6  ;;  %822 = vmatprep.subr.bf16.mxu0 %v890_v1  ;;  %v345_v17 = vld [vmem:[%s323_s22] sm:$0xf]  ;;  %s331_s30 = scalar_lea.vmem %s1037_s4, %s994_s15  ;;  %s340_s14 = scalar_lea.vmem %s1040_s7, %s1043_s28 }
  0x11   : > { %842 = vmatprep.subr.bf16.mxu1 %v890_v1  ;;  %s337_s17 = scalar_lea.vmem %s1039_s6, %s1043_s28  ;;  %s343_s20 = scalar_lea.vmem %s1041_s8, %s1043_s28 }
  0x13   : > { %823 = vmatpush3.bf16.msra.mxu0 %v872_v7 }
  0x14   : > { %843 = vmatpush3.bf16.msra.mxu1 %v873_v8  ;;  %824 = vmatprep.subr.bf16.mxu0 %v890_v1 }
  0x15   : > { %844 = vmatprep.subr.bf16.mxu1 %v890_v1 }
  0x17   : > { %825 = vmatpush3.bf16.msra.mxu0 %v874_v9 }
  0x18   : > { %845 = vmatpush3.bf16.msra.mxu1 %v875_v10  ;;  %826 = vmatprep.subr.bf16.mxu0 %v890_v1 }
  0x19   : > { %846 = vmatprep.subr.bf16.mxu1 %v890_v1 }
  0x1b   : > { %827 = vmatpush3.bf16.msra.mxu0 %v876_v11 }
  0x1c   : > { %847 = vmatpush3.bf16.msra.mxu1 %v877_v12  ;;  %828 = vmatprep.subr.bf16.mxu0 %v890_v1 }
  0x1d   : > { %848 = vmatprep.subr.bf16.mxu1 %v890_v1 }
  0x1f   : > { %829 = vmatpush3.bf16.msra.mxu0 %v878_v13 }
  0x20   : > { %849 = vmatpush3.bf16.msra.mxu1 %v879_v14  ;;  %830 = vmatprep.subr.bf16.mxu0 %v890_v1 }
  0x21   : > { %850 = vmatprep.subr.bf16.mxu1 %v890_v1 }
  0x23   : > { %831 = vmatpush3.bf16.msra.mxu0 %v880_v15 }
  0x24   : > { %851 = vmatpush3.bf16.msra.mxu1 %v881_v16 }
  0x26   : > { %833 = vmatmul.mubr.bf16.vlgmr.msra.gmra.mrb[0].mxu0 %v345_v17 }
  0x27   : > { %853 = vmatmul.mubr.bf16.vlgmr.msra.gmra.mrb[0].mxu1 %v345_v17 }
  0xf9   : > { %v444_v18 = vpop.f32.mrb[0].mxu0 }
  0xfa   : > { %v450_v19 = vpack.c.bf16 %v444_v18, %v444_v18  ;;  %v452_v20 = vrot.slane %v444_v18, 4  ;;  %v459_v21 = vmul.f32 %v444_v18, %v444_v18  ;;  %v565_v22 = vpop.f32.mrb[0].mxu1  ;;  %v834_v23 = vpop.f32.mrb[1].mxu0 }
  0xfb   : > { %v571_v24 = vpack.c.bf16 %v565_v22, %v565_v22  ;;  %v573_v25 = vrot.slane %v565_v22, 4  ;;  %v580_v26 = vmul.f32 %v565_v22, %v565_v22  ;;  %v854_v27 = vpop.f32.mrb[1].mxu1  ;;  %v447_v28 = vpop.f32.mrb[2].mxu0 }
  0xfc   : > { %451 = vst [vmem:[%s327_s25] sm:$0xf] %v450_v19  ;;  %v453_v29 = vadd.f32 %v452_v20, %v444_v18  ;;  %v460_v30 = vrot.slane %v459_v21, 4  ;;  %v568_v31 = vpop.f32.mrb[2].mxu1  ;;  %v835_v32 = vpop.f32.mrb[3].mxu0 }
  0xfd   : > { %572 = vst [vmem:[%s331_s30] sm:$0xf] %v571_v24  ;;  %v574_v33 = vadd.f32 %v573_v25, %v565_v22  ;;  %v581_v34 = vrot.slane %v580_v26, 4  ;;  %v855_v35 = vpop.f32.mrb[3].mxu1 }
  0xfe   : > { %v454_v36 = vrot.slane %v453_v29, 2  ;;  %v461_v37 = vadd.f32 %v460_v30, %v459_v21 }
  0xff   : > { %v575_v38 = vrot.slane %v574_v33, 2  ;;  %v582_v39 = vadd.f32 %v581_v34, %v580_v26 }
 0x100   : > { %v455_v40 = vadd.f32 %v454_v36, %v453_v29  ;;  %v462_v41 = vrot.slane %v461_v37, 2 }
 0x101   : > { %v576_v42 = vadd.f32 %v575_v38, %v574_v33  ;;  %v583_v43 = vrot.slane %v582_v39, 2 }
 0x102   : > { %v456_v44 = vrot.slane %v455_v40, 1  ;;  %v463_v45 = vadd.f32 %v462_v41, %v461_v37 }
 0x103   : > { %v577_v46 = vrot.slane %v576_v42, 1  ;;  %v584_v47 = vadd.f32 %v583_v43, %v582_v39 }
 0x104   : > { %v457_v48 = vadd.f32 %v456_v44, %v455_v40  ;;  %v464_v49 = vrot.slane %v463_v45, 1 }
 0x105   : > { %v578_v50 = vadd.f32 %v577_v46, %v576_v42  ;;  %v585_v51 = vrot.slane %v584_v47, 1 }
 0x106   : > { %458 = vst [vmem:[%s334_s11] sm:$0x1] %v457_v48  ;;  %v465_v52 = vadd.f32 %v464_v49, %v463_v45 }
 0x107   : > { %579 = vst [vmem:[%s340_s14] sm:$0x1] %v578_v50  ;;  %v586_v53 = vadd.f32 %v585_v51, %v584_v47 }
 0x108   : > { %466 = vst [vmem:[%s337_s17] sm:$0x1] %v465_v52 }
 0x109   : > { %587 = vst [vmem:[%s343_s20] sm:$0x1] %v586_v53 }
 0x10a PF: > { %s19_s27 = sadd.s32 1, %s888_s27  }
 0x10b   : > { %p16_p4 = scmp.ge.s32.totalorder %s19_s27, 4  }
 0x10d   :  { %18 = sbr.rel (!%p16_p4) target bundleno = 1 (0x1), region = 122 }

// kernel: res_layer_forward.4
= control target key start
LH: loop header
LB: loop body
LE: loop exit
PB: predicated region body
PF: predicated region fallthrough
CT: control target
= control target key end

     0   :  { %s998_s21 = smov 0   ;;  %s1138_s0 = inlined_call_operand.vmem [shape: bf16[2,8,128], index: 0, kind: input, shape index: {}]   ;;  %s1139_s1 = inlined_call_operand.vmem [shape: f32[1,128], index: 1, kind: input, shape index: {}]   ;;  %s1140_s2 = inlined_call_operand.vmem [shape: f32[1,128], index: 2, kind: input, shape index: {}]   ;;  %s1141_s3 = inlined_call_operand.vmem [shape: bf16[3,128,128], index: 3, kind: input, shape index: {}]   ;;  %s1142_s4 = inlined_call_operand.vmem [shape: bf16[2,8,128], index: 4, kind: output, shape index: {0}]   ;;  %s1143_s5 = inlined_call_operand.vmem [shape: f32[2,1,128], index: 5, kind: output, shape index: {1}]   ;;  %s1144_s6 = inlined_call_operand.vmem [shape: f32[2,1,128], index: 6, kind: output, shape index: {2}]  }
   0x1 LB: > { %s754_s22 = sadd.s32 4294967295, %s958_s21   ;;  %p758_p0 = scmp.ge.s32.totalorder %s958_s21, 1  ;;  %s958_s21 = sphi %s998_s21, %s17_s21  }
   0x2   : > { %p216_p1 = scmp.lt.s32.totalorder %s958_s21, 3 }
   0x4   : > { %p217_p2 = pnand %p758_p0, %p216_p1 }
   0x5   : > { %v926_v0 = vld [vmem:[%s1141_s3] sm:$0xff] (!%p217_p2)   ;;  %v960_v1 = vmov (!%p217_p2), 0.0   ;;  %v927_v2 = vld [vmem:[%s1141_s3 + $0x8] sm:$0xff] (!%p217_p2)   ;;  %vm961_vm0 = vmmov (!%p217_p2), 0   ;;  %p250_p3 = scmp.lt.s32.totalorder (!%p217_p2), %s754_s22, 1  ;;  %v962_v3 = vmov (!%p217_p2), 0  }
   0x6   : > { %220 = sbr.rel (%p217_p2) target bundleno = 304 (0x130), region = 36  ;;  %870 = vmatprep.subr.bf16.mxu0 (!%p217_p2), %v960_v1  ;;  %850 = vmatprep.subr.bf16.mxu1 (!%p217_p2), %v960_v1  ;;  %284 = vst [vmem:[#allocation2] sm:$0xf] (!%p217_p2), %v962_v3  ;;  %285 = vst [vmem:[#allocation2 + $0x8] sm:$0xf] (!%p217_p2), %v962_v3  ;;  %v928_v4 = vld [vmem:[%s1141_s3 + $0x10] sm:$0xff] (!%p217_p2)  }
   0x7   : > { %871 = vmatpush3.bf16.msra.mxu0 (!%p217_p2), %v926_v0  ;;  %886 = vmatprep.mubr.msk.bf16.mxu0 (!%p217_p2), %vm961_vm0, %v960_v1  ;;  %v934_v5 = vld [vmem:[%s1141_s3 + $0x40] sm:$0xff] (!%p217_p2)   ;;  %v929_v8 = vld [vmem:[%s1141_s3 + $0x18] sm:$0xff] (!%p217_p2)   ;;  %v937_v12 = vld [vmem:[%s1141_s3 + $0x48] sm:$0xff] (!%p217_p2)  }
   0x8   : > { %872 = vmatprep.subr.bf16.mxu0 (!%p217_p2), %v960_v1  ;;  %866 = vmatprep.mubr.msk.bf16.mxu1 (!%p217_p2), %vm961_vm0, %v960_v1  ;;  %v761_v7 = vld [vmem:[%s1139_s1] ss:$0 sm:$0xff] (!%p217_p2)  ;;  %v939_v15 = vld [vmem:[%s1141_s3 + $0x50] sm:$0xff] (!%p217_p2)   ;;  %v931_v17 = vld [vmem:[%s1141_s3 + $0x28] sm:$0xff] (!%p217_p2)  }
   0x9   : > { %851 = vmatpush3.bf16.msra.mxu1 (!%p217_p2), %v934_v5  ;;  %v762_v10 = vld [vmem:[%s1140_s2] ss:$0 sm:$0xff] (!%p217_p2)  ;;  %v941_v19 = vld [vmem:[%s1141_s3 + $0x58] sm:$0xff] (!%p217_p2)   ;;  %v932_v20 = vld [vmem:[%s1141_s3 + $0x30] sm:$0xff] (!%p217_p2)  }
   0xa   : > { %852 = vmatprep.subr.bf16.mxu1 (!%p217_p2), %v960_v1  ;;  %v930_v13 = vld [vmem:[%s1141_s3 + $0x20] sm:$0xff] (!%p217_p2)   ;;  %v933_v23 = vld [vmem:[%s1141_s3 + $0x38] sm:$0xff] (!%p217_p2)   ;;  %v945_v24 = vld [vmem:[%s1141_s3 + $0x68] sm:$0xff] (!%p217_p2)  }
   0xb   : > { %873 = vmatpush3.bf16.msra.mxu0 (!%p217_p2), %v927_v2  ;;  %v943_v21 = vld [vmem:[%s1141_s3 + $0x60] sm:$0xff] (!%p217_p2)   ;;  %v947_v29 = vld [vmem:[%s1141_s3 + $0x70] sm:$0xff] (!%p217_p2)   ;;  %v949_v34 = vld [vmem:[%s1141_s3 + $0x78] sm:$0xff] (!%p217_p2)  }
   0xc   : > { %874 = vmatprep.subr.bf16.mxu0 (!%p217_p2), %v960_v1  ;;  %v936_v32 = vld [vmem:[%s1141_s3 + $0x80] sm:$0xff] (!%p217_p2)   ;;  %v938_v35 = vld [vmem:[%s1141_s3 + $0x88] sm:$0xff] (!%p217_p2)   ;;  %v940_v36 = vld [vmem:[%s1141_s3 + $0x90] sm:$0xff] (!%p217_p2)  }
   0xd   : > { %s1146_s22 = smov (!%p250_p3, %s754_s22), 1  ;;  %853 = vmatpush3.bf16.msra.mxu1 %v937_v12  ;;  %v288_v22 = vld [vmem:[#allocation2] sm:$0x8]  ;;  %v942_v37 = vld [vmem:[%s1141_s3 + $0x98] sm:$0xff]   ;;  %v946_v40 = vld [vmem:[%s1141_s3 + $0xa8] sm:$0xff]  }
   0xe   : > { %s759_s29 = sshll.u32 %s1146_s22, 2  ;;  %854 = vmatprep.subr.bf16.mxu1 %v960_v1  ;;  %v944_v38 = vld [vmem:[%s1141_s3 + $0xa0] sm:$0xff]   ;;  %v948_v42 = vld [vmem:[%s1141_s3 + $0xb0] sm:$0xff]   ;;  %v950_v45 = vld [vmem:[%s1141_s3 + $0xb8] sm:$0xff]   ;;  %s260_s18 = scalar_lea.vmem %s1143_s5, %s1146_s22 }
   0xf   : > { %s253_s8 = scalar_lea.vmem %s1138_s0, %s759_s29  ;;  %875 = vmatpush3.bf16.msra.mxu0 %v928_v4  ;;  %s257_s15 = scalar_lea.vmem %s1142_s4, %s759_s29 }
  0x10   : > { %v265_v6 = vld [vmem:[%s253_s8] sm:$0xf]  ;;  %876 = vmatprep.subr.bf16.mxu0 %v960_v1  ;;  %s263_s20 = scalar_lea.vmem %s1144_s6, %s1146_s22 }
  0x11   : > { %v266_v9 = vunpack.c.l.bf16 %v265_v6  ;;  %855 = vmatpush3.bf16.msra.mxu1 %v939_v15 }
  0x12   : > { %856 = vmatprep.subr.bf16.mxu1 %v960_v1 }
  0x13   : > { %v274_v11 = vmul.f32 %v761_v7, %v266_v9  ;;  %877 = vmatpush3.bf16.msra.mxu0 %v929_v8 }
  0x14   : > { %878 = vmatprep.subr.bf16.mxu0 %v960_v1 }
  0x15   : > { %v282_v14 = vadd.f32 %v762_v10, %v274_v11  ;;  %857 = vmatpush3.bf16.msra.mxu1 %v941_v19 }
  0x16   : > { %858 = vmatprep.subr.bf16.mxu1 %v960_v1 }
  0x17   : > { %v283_v16 = vmax.f32 %v282_v14, 0.0  ;;  %879 = vmatpush3.bf16.msra.mxu0 %v930_v13 }
  0x18   : > { %880 = vmatprep.subr.bf16.mxu0 %v960_v1 }
  0x19   : > { %v286_v18 = vpack.c.bf16 %v283_v16, %v283_v16  ;;  %859 = vmatpush3.bf16.msra.mxu1 %v943_v21 }
  0x1a   : > { %860 = vmatprep.subr.bf16.mxu1 %v960_v1 }
  0x1b   : > { %287 = vst [vmem:[#allocation2 + $0x4] sm:$0xf] %v286_v18  ;;  %881 = vmatpush3.bf16.msra.mxu0 %v931_v17 }
  0x1c   : > { %882 = vmatprep.subr.bf16.mxu0 %v960_v1 }
  0x1d   : > { %861 = vmatpush3.bf16.msra.mxu1 %v945_v24 }
  0x1e   : > { %862 = vmatprep.subr.bf16.mxu1 %v960_v1 }
  0x1f   : > { %883 = vmatpush3.bf16.msra.mxu0 %v932_v20 }
  0x20   : > { %884 = vmatprep.subr.bf16.mxu0 %v960_v1 }
  0x21   : > { %863 = vmatpush3.bf16.msra.mxu1 %v947_v29 }
  0x22   : > { %v289_v25 = vld [vmem:[#allocation2 + $0x4] sm:$0xf]  ;;  %864 = vmatprep.subr.bf16.mxu1 %v960_v1 }
  0x23   : > { %v787_v26 = vcombine.low %v288_v22, %v289_v25  ;;  %885 = vmatpush3.bf16.msra.mxu0 %v933_v23  ;;  %v951_v39 = vld [vmem:[#allocation2 + $0x4] sm:$0x1f]  }
  0x24   : > { %890 = vmatprep.subr.bf16.mxu0 %v960_v1  ;;  %v540_v41 = vshll.u32 %v951_v39, 16  ;;  %v538_v43 = vshrl.u32 %v951_v39, 16 }
  0x25   : > { %v417_v27 = vshrl.u32 %v787_v26, 16  ;;  %v420_v28 = vshll.u32 %v787_v26, 16  ;;  %865 = vmatpush3.bf16.msra.mxu1 %v949_v34 }
  0x26   : > { %v542_v44 = vrot.slane %v540_v41, 1 }
  0x27   : > { %v419_v30 = vrot.slane %v417_v27, 3  ;;  %v422_v31 = vrot.slane %v420_v28, 4 }
  0x28   : > { %867 = vmatmul.mubr.bf16.vlgmr.msra.gmra.mrb[0].mxu1 %v289_v25  ;;  %v543_v46 = vor.u32 %v542_v44, %v538_v43 }
  0x29   : > { %v423_v33 = vor.u32 %v422_v31, %v419_v30 }
  0x2b   : > { %887 = vmatmul.mubr.bf16.vlgmr.msra.gmra.mrb[0].mxu0 %v423_v33 }
  0x2c   : > { %891 = vmatpush3.bf16.msra.mxu0 %v936_v32  ;;  %906 = vmatprep.mubr.msk.bf16.mxu0 %vm961_vm0, %v960_v1 }
  0x2d   : > { %892 = vmatprep.subr.bf16.mxu0 %v960_v1 }
  0x30   : > { %893 = vmatpush3.bf16.msra.mxu0 %v938_v35 }
  0x31   : > { %894 = vmatprep.subr.bf16.mxu0 %v960_v1 }
  0x34   : > { %895 = vmatpush3.bf16.msra.mxu0 %v940_v36 }
  0x35   : > { %896 = vmatprep.subr.bf16.mxu0 %v960_v1 }
  0x38   : > { %897 = vmatpush3.bf16.msra.mxu0 %v942_v37 }
  0x39   : > { %898 = vmatprep.subr.bf16.mxu0 %v960_v1 }
  0x3c   : > { %899 = vmatpush3.bf16.msra.mxu0 %v944_v38 }
  0x3d   : > { %900 = vmatprep.subr.bf16.mxu0 %v960_v1 }
  0x40   : > { %901 = vmatpush3.bf16.msra.mxu0 %v946_v40 }
  0x41   : > { %902 = vmatprep.subr.bf16.mxu0 %v960_v1 }
  0x44   : > { %903 = vmatpush3.bf16.msra.mxu0 %v948_v42 }
  0x45   : > { %904 = vmatprep.subr.bf16.mxu0 %v960_v1 }
  0x48   : > { %905 = vmatpush3.bf16.msra.mxu0 %v950_v45 }
  0x4b   : > { %907 = vmatmul.mubr.bf16.vlgmr.msra.gmra.mrb[0].mxu0 %v543_v46 }
  0xfb   : > { %v405_v47 = vpop.f32.mrb[0].mxu1 }
  0xfc   : > { %v868_v48 = vpop.f32.mrb[1].mxu1 }
  0xfd   : > { %v408_v49 = vpop.f32.mrb[2].mxu1 }
  0xfe   : > { %v869_v50 = vpop.f32.mrb[3].mxu1 }
 0x11e   : > { %v627_v51 = vpop.f32.mrb[0].mxu0 }
 0x11f   : > { %v910_v52 = vadd.f32 %v627_v51, %v405_v47  ;;  %v908_v53 = vpop.f32.mrb[1].mxu0 }
 0x120   : > { %v630_v54 = vpop.f32.mrb[2].mxu0 }
 0x121   : > { %v634_v55 = vpack.c.bf16 %v910_v52, %v910_v52  ;;  %v636_v56 = vrot.slane %v910_v52, 4  ;;  %v643_v57 = vmul.f32 %v910_v52, %v910_v52  ;;  %v909_v58 = vpop.f32.mrb[3].mxu0 }
 0x123   : > { %635 = vst [vmem:[%s257_s15] sm:$0xf] %v634_v55  ;;  %v637_v59 = vadd.f32 %v910_v52, %v636_v56  ;;  %v644_v60 = vrot.slane %v643_v57, 4 }
 0x125   : > { %v638_v61 = vrot.slane %v637_v59, 2  ;;  %v645_v62 = vadd.f32 %v644_v60, %v643_v57 }
 0x127   : > { %v639_v63 = vadd.f32 %v638_v61, %v637_v59  ;;  %v646_v0 = vrot.slane %v645_v62, 2 }
 0x129   : > { %v640_v1 = vrot.slane %v639_v63, 1  ;;  %v647_v2 = vadd.f32 %v646_v0, %v645_v62 }
 0x12b   : > { %v641_v3 = vadd.f32 %v640_v1, %v639_v63  ;;  %v648_v4 = vrot.slane %v647_v2, 1 }
 0x12d   : > { %642 = vst [vmem:[%s260_s18] sm:$0x1] %v641_v3  ;;  %v649_v5 = vadd.f32 %v648_v4, %v647_v2 }
 0x12f   : > { %650 = vst [vmem:[%s263_s20] sm:$0x1] %v649_v5 }
 0x130 PF: > { %s17_s21 = sadd.s32 1, %s958_s21  }
 0x131   : > { %p14_p4 = scmp.ge.s32.totalorder %s17_s21, 4  }
 0x133   :  { %16 = sbr.rel (!%p14_p4) target bundleno = 1 (0x1), region = 92 }

</bundles_post_ra>
